<compile_context>
chip_gen: v6e
topology: v6e:2x2x1
jax: 0.10.0
libtpu: 0.0.40
codegen_flags: <defaults>
</compile_context>

<pallas_src>
import functools

import jax
import jax.numpy as jnp
from jax.experimental import pallas as pl
from jax.experimental.pallas import tpu as pltpu


def _round_up(x: int, m: int) -> int:
    return ((x + m - 1) // m) * m


def _residual_kernel(x_ref, w_ref, shift_ref, o_ref):
    """One grid step = one (TM, Cin) tile of the flattened activations.

    x_ref:     (TM, Cin)    flattened, already-strided NHWC activations
    w_ref:     (Cin, Cout)  1x1 conv weight with BN scale folded in
    shift_ref: (1, Cout)    folded BN shift = beta - mean * scale
    o_ref:     (TM, Cout)
    """
    y = jnp.dot(x_ref[...], w_ref[...], preferred_element_type=jnp.float32)
    y = y + shift_ref[...]
    o_ref[...] = y.astype(o_ref.dtype)


def resnet_residual(x_nchw, conv_w, gamma, beta, running_mean, running_var,
                    *, stride=2, eps=1e-5):
    """Pallas implementation of ResNetResidual.forward (eval-mode BN)."""
    n, cin, h, w = x_nchw.shape
    cout = conv_w.shape[0]
    h_out = (h - 1) // stride + 1
    w_out = (w - 1) // stride + 1

    compute_dtype = x_nchw.dtype
    out_dtype = x_nchw.dtype

    # --- Fold BN (eval) into the 1x1 conv ------------------------------------
    inv_std = 1.0 / jnp.sqrt(running_var.astype(jnp.float32) + eps)
    scale = gamma.astype(jnp.float32) * inv_std                       # (Cout,)
    shift = (beta.astype(jnp.float32)
             - running_mean.astype(jnp.float32) * scale)              # (Cout,)
    # (Cout, Cin, 1, 1) -> (Cin, Cout), scale folded into the weight.
    wmat = (conv_w.reshape(cout, cin).T.astype(jnp.float32)
            * scale[None, :]).astype(compute_dtype)                   # (Cin, Cout)
    shift = shift.reshape(1, cout).astype(jnp.float32)

    # --- One wrapper pass: stride-subsample + NCHW->NHWC + flatten -----------
    x_flat = jnp.transpose(
        x_nchw[:, :, ::stride, ::stride], (0, 2, 3, 1)
    ).reshape(n * h_out * w_out, cin).astype(compute_dtype)           # (M, Cin)

    m = n * h_out * w_out
    # Big MXU-friendly M tiles; shrink for tiny problems (sublane multiple of 8).
    tm = min(1024, _round_up(m, 8))
    m_pad = _round_up(m, tm)
    if m_pad != m:
        x_flat = jnp.pad(x_flat, ((0, m_pad - m), (0, 0)))

    grid_m = m_pad // tm

    out_flat = pl.pallas_call(
        _residual_kernel,
        out_shape=jax.ShapeDtypeStruct((m_pad, cout), out_dtype),
        grid_spec=pltpu.PrefetchScalarGridSpec(
            num_scalar_prefetch=0,
            grid=(grid_m,),
            in_specs=[
                pl.BlockSpec((tm, cin), lambda i: (i, 0)),
                pl.BlockSpec((cin, cout), lambda i: (0, 0)),
                pl.BlockSpec((1, cout), lambda i: (0, 0)),
            ],
            out_specs=pl.BlockSpec((tm, cout), lambda i: (i, 0)),
        ),
        compiler_params=pltpu.CompilerParams(
            dimension_semantics=("parallel",),
            vmem_limit_bytes=64 * 1024 * 1024),
    )(x_flat, wmat, shift)

    # Glue: back to PyTorch's NCHW.
    out = out_flat[:m].reshape(n, h_out, w_out, cout)
    return jnp.transpose(out, (0, 3, 1, 2))


def _reference(x_nchw, conv_w, gamma, beta, running_mean, running_var,
               *, stride=2, eps=1e-5):
    """Plain-JAX reference matching PyTorch Conv2d(k=1, stride, bias=False) + BN(eval)."""
    y = jax.lax.conv_general_dilated(
        x_nchw, conv_w, window_strides=(stride, stride), padding="VALID",
        dimension_numbers=("NCHW", "OIHW", "NCHW"))
    scale = gamma / jnp.sqrt(running_var + eps)
    shift = beta - running_mean * scale
    return y * scale[None, :, None, None] + shift[None, :, None, None]


if __name__ == "__main__":
    N, Cin, Cout, H, W, STRIDE = 2, 4, 8, 16, 16, 2

    key = jax.random.PRNGKey(0)
    k1, k2, k3, k4, k5, k6 = jax.random.split(key, 6)

    # Deterministic synthetic parameters (shapes from the module __init__).
    x = jax.random.normal(k1, (N, Cin, H, W), jnp.float32)
    conv_w = jax.random.normal(k2, (Cout, Cin, 1, 1), jnp.float32) * 0.1
    gamma = jax.random.uniform(k3, (Cout,), jnp.float32, minval=0.5, maxval=1.5)
    beta = jax.random.normal(k4, (Cout,), jnp.float32) * 0.1
    running_mean = jax.random.normal(k5, (Cout,), jnp.float32) * 0.1
    running_var = jax.random.uniform(k6, (Cout,), jnp.float32, minval=0.5, maxval=1.5)

    out = resnet_residual(x, conv_w, gamma, beta, running_mean, running_var,
                          stride=STRIDE)
    out = jax.block_until_ready(out)

    ref = _reference(x, conv_w, gamma, beta, running_mean, running_var,
                     stride=STRIDE)

    assert out.shape == (N, Cout, H // STRIDE, W // STRIDE), out.shape
    assert jnp.allclose(out, ref, atol=1e-5, rtol=1e-5), \
        float(jnp.max(jnp.abs(out - ref)))

    print("KERNEL_OK")
</pallas_src>

<mosaic_0001>
module attributes {stable_mosaic.version = 11 : i64} {
  func.func @_residual_kernel(%arg0: i32, %arg1: memref<128x4xf32, #tpu.memory_space<vmem>>, %arg2: memref<4x8xf32, #tpu.memory_space<vmem>>, %arg3: memref<1x8xf32, #tpu.memory_space<vmem>>, %arg4: memref<128x8xf32, #tpu.memory_space<vmem>>) attributes {dimension_semantics = [#tpu.dimension_semantics<parallel>], iteration_bounds = array<i64: 1>, scalar_prefetch = 0 : i64, scratch_operands = 0 : i64, tpu.core_type = #tpu.core_type<tc>, window_params = [{transform_indices = @transform_0, window_bounds = array<i64: 128, 4>}, {pipeline_mode = #tpu.pipeline_mode<synchronous>, transform_indices = @transform_1, window_bounds = array<i64: 4, 8>}, {pipeline_mode = #tpu.pipeline_mode<synchronous>, transform_indices = @transform_2, window_bounds = array<i64: 1, 8>}, {transform_indices = @transform_3, window_bounds = array<i64: 128, 8>}]} {
    %c0 = arith.constant 0 : index
    %c0_0 = arith.constant 0 : index
    %0 = vector.load %arg1[%c0, %c0_0] : memref<128x4xf32, #tpu.memory_space<vmem>>, vector<128x4xf32>
    %c0_1 = arith.constant 0 : index
    %c0_2 = arith.constant 0 : index
    %1 = vector.load %arg2[%c0_1, %c0_2] : memref<4x8xf32, #tpu.memory_space<vmem>>, vector<4x8xf32>
    %cst = arith.constant dense<0.000000e+00> : vector<128x8xf32>
    %2 = tpu.matmul %0, %1, %cst {dimension_numbers = #tpu.dot_dimension_numbers<[1], [0], [0], [1], [0, 0, 1, 1], [], []>} : vector<128x4xf32>, vector<4x8xf32>, vector<128x8xf32> -> vector<128x8xf32>
    %c0_3 = arith.constant 0 : index
    %c0_4 = arith.constant 0 : index
    %3 = vector.load %arg3[%c0_3, %c0_4] : memref<1x8xf32, #tpu.memory_space<vmem>>, vector<1x8xf32>
    %4 = vector.broadcast %3 : vector<1x8xf32> to vector<128x8xf32>
    %5 = arith.addf %2, %4 : vector<128x8xf32>
    %c0_5 = arith.constant 0 : index
    %c0_6 = arith.constant 0 : index
    %6 = vector.load %arg4[%c0_5, %c0_6] : memref<128x8xf32, #tpu.memory_space<vmem>>, vector<128x8xf32>
    tpu.vector_store %arg4[%c0_5, %c0_6], %5 {strides = array<i32>} : memref<128x8xf32, #tpu.memory_space<vmem>>, vector<128x8xf32>,
    return
  }
  func.func @transform_0(%arg0: i32) -> (i32, i32) {
    %c0_i32 = arith.constant 0 : i32
    %c0_i32_0 = arith.constant 0 : i32
    return %arg0, %c0_i32 : i32, i32
  }
  func.func @transform_1(%arg0: i32) -> (i32, i32) {
    %c0_i32 = arith.constant 0 : i32
    %c0_i32_0 = arith.constant 0 : i32
    %c0_i32_1 = arith.constant 0 : i32
    return %c0_i32, %c0_i32_0 : i32, i32
  }
  func.func @transform_2(%arg0: i32) -> (i32, i32) {
    %c0_i32 = arith.constant 0 : i32
    %c0_i32_0 = arith.constant 0 : i32
    %c0_i32_1 = arith.constant 0 : i32
    return %c0_i32, %c0_i32_0 : i32, i32
  }
  func.func @transform_3(%arg0: i32) -> (i32, i32) {
    %c0_i32 = arith.constant 0 : i32
    %c0_i32_0 = arith.constant 0 : i32
    return %arg0, %c0_i32 : i32, i32
  }
}

</mosaic_0001>

<bundles_post_ra>
// kernel: tpu_custom_call.1
= control target key start
LH: loop header
LB: loop body
LE: loop exit
PB: predicated region body
PF: predicated region fallthrough
CT: control target
= control target key end

     0   :  { %vm87_vm0 = vcmask 1043456   ;;  %vm38_vm1 = vcmask 31744   ;;  %vm236_vm2 = vcmask 64512   ;;  %s474_s1 = inlined_call_operand.vmem [shape: f32[4,8], index: 1, kind: input, shape index: {}]   ;;  %s475_s0 = inlined_call_operand.vmem [shape: f32[128,4], index: 0, kind: input, shape index: {}]   ;;  %s476_s2 = inlined_call_operand.vmem [shape: f32[1,8], index: 2, kind: input, shape index: {}]   ;;  %s477_s3 = inlined_call_operand.vmem [shape: f32[128,8], index: 3, kind: output, shape index: {}]  }
   0x1   :  { %v30_v0 = vld [vmem:[%s474_s1] sm:$0xf]  ;;  %v15_v3 = vld [vmem:[%s475_s0 + $0x8] sm:$0xff]  ;;  %v16_v5 = vld [vmem:[%s475_s0 + $0x10] sm:$0xff] }
   0x2   :  { %v14_v1 = vld [vmem:[%s475_s0] sm:$0xff]  ;;  %292 = vmatprep.subr.msk.mxu0 %vm87_vm0, %v30_v0  ;;  %318 = vmatprep.subr.msk.mxu1 %vm87_vm0, %v30_v0  ;;  %v23_v4 = vld [vmem:[%s475_s0 + $0x48] sm:$0xff]  ;;  %v24_v6 = vld [vmem:[%s475_s0 + $0x50] sm:$0xff] }
   0x3   :  { %v22_v2 = vld [vmem:[%s475_s0 + $0x40] sm:$0xff]  ;;  %293 = vmatpush3.msk.msra.mxu0 %vm87_vm0, %v30_v0  ;;  %319 = vmatpush3.msk.msra.mxu1 %vm87_vm0, %v30_v0  ;;  %v17_v7 = vld [vmem:[%s475_s0 + $0x18] sm:$0xff]  ;;  %v19_v11 = vld [vmem:[%s475_s0 + $0x28] sm:$0xff] }
   0x4   :  { %294 = vmatprep.mubr.msk.f32.mxu0 %vm38_vm1, %v14_v1  ;;  %306 = vmatprep.mubr.msk.f32.mxu1 %vm38_vm1, %v22_v2  ;;  %v25_v8 = vld [vmem:[%s475_s0 + $0x58] sm:$0xff]  ;;  %v18_v9 = vld [vmem:[%s475_s0 + $0x20] sm:$0xff]  ;;  %v27_v12 = vld [vmem:[%s475_s0 + $0x68] sm:$0xff] }
   0x5   :  { %295 = vmatmul.mubr.msk.f32.vlgmr.msra.gmra.mxu0 %vm38_vm1, %v15_v3  ;;  %307 = vmatmul.mubr.msk.f32.vlgmr.msra.gmra.mxu1 %vm38_vm1, %v23_v4  ;;  %v26_v10 = vld [vmem:[%s475_s0 + $0x60] sm:$0xff]  ;;  %v20_v13 = vld [vmem:[%s475_s0 + $0x30] sm:$0xff]  ;;  %v21_v15 = vld [vmem:[%s475_s0 + $0x38] sm:$0xff] }
   0x6   :  { %297 = vmatprep.mubr.msk.f32.mxu0 %vm38_vm1, %v16_v5  ;;  %309 = vmatprep.mubr.msk.f32.mxu1 %vm38_vm1, %v24_v6  ;;  %v28_v14 = vld [vmem:[%s475_s0 + $0x70] sm:$0xff]  ;;  %v29_v16 = vld [vmem:[%s475_s0 + $0x78] sm:$0xff]  ;;  %v257_v17 = vld [vmem:[%s476_s2] ss:$0 sm:$0xff] }
   0x9   :  { %298 = vmatmul.mubr.msk.f32.gmra.mxu0 %vm38_vm1, %v17_v7  ;;  %310 = vmatmul.mubr.msk.f32.gmra.mxu1 %vm38_vm1, %v25_v8 }
   0xa   :  { %300 = vmatprep.mubr.msk.f32.mxu0 %vm38_vm1, %v18_v9  ;;  %312 = vmatprep.mubr.msk.f32.mxu1 %vm38_vm1, %v26_v10 }
   0xd   :  { %301 = vmatmul.mubr.msk.f32.gmra.mxu0 %vm38_vm1, %v19_v11  ;;  %313 = vmatmul.mubr.msk.f32.gmra.mxu1 %vm38_vm1, %v27_v12 }
   0xe   :  { %303 = vmatprep.mubr.msk.f32.mxu0 %vm38_vm1, %v20_v13  ;;  %315 = vmatprep.mubr.msk.f32.mxu1 %vm38_vm1, %v28_v14 }
  0x11   :  { %304 = vmatmul.mubr.msk.f32.gmra.mxu0 %vm38_vm1, %v21_v15  ;;  %316 = vmatmul.mubr.msk.f32.gmra.mxu1 %vm38_vm1, %v29_v16 }
  0xc5   :  { %v296_v18 = vpop.f32.mrf.mxu0  ;;  %v308_v19 = vpop.f32.mrf.mxu1 }
  0xc6   :  { %v163_v20 = vadd.f32 %v296_v18, %v257_v17  ;;  %v203_v21 = vadd.f32 %v308_v19, %v257_v17 }
  0xc7   :  { %v157_v22 = vpop.f32.mrf.mxu0  ;;  %v197_v23 = vpop.f32.mrf.mxu1 }
  0xc8   :  { %238 = vst.msk [vmem:[%s477_s3 + $0x8] sm:$0xff] %vm236_vm2, %v163_v20  ;;  %246 = vst.msk [vmem:[%s477_s3 + $0x48] sm:$0xff] %vm236_vm2, %v203_v21  ;;  %v158_v24 = vadd.f32 %v257_v17, %v157_v22  ;;  %v198_v25 = vadd.f32 %v257_v17, %v197_v23 }
  0xc9   :  { %v299_v26 = vpop.f32.mrf.mxu0  ;;  %v311_v27 = vpop.f32.mrf.mxu1 }
  0xca   :  { %237 = vst.msk [vmem:[%s477_s3] sm:$0xff] %vm236_vm2, %v158_v24  ;;  %245 = vst.msk [vmem:[%s477_s3 + $0x40] sm:$0xff] %vm236_vm2, %v198_v25  ;;  %v173_v28 = vadd.f32 %v299_v26, %v257_v17  ;;  %v213_v29 = vadd.f32 %v311_v27, %v257_v17 }
  0xcb   :  { %v167_v30 = vpop.f32.mrf.mxu0  ;;  %v207_v31 = vpop.f32.mrf.mxu1 }
  0xcc   :  { %240 = vst.msk [vmem:[%s477_s3 + $0x18] sm:$0xff] %vm236_vm2, %v173_v28  ;;  %248 = vst.msk [vmem:[%s477_s3 + $0x58] sm:$0xff] %vm236_vm2, %v213_v29  ;;  %v168_v32 = vadd.f32 %v257_v17, %v167_v30  ;;  %v208_v33 = vadd.f32 %v257_v17, %v207_v31 }
  0xcd   :  { %v302_v34 = vpop.f32.mrf.mxu0  ;;  %v314_v35 = vpop.f32.mrf.mxu1 }
  0xce   :  { %239 = vst.msk [vmem:[%s477_s3 + $0x10] sm:$0xff] %vm236_vm2, %v168_v32  ;;  %247 = vst.msk [vmem:[%s477_s3 + $0x50] sm:$0xff] %vm236_vm2, %v208_v33  ;;  %v183_v36 = vadd.f32 %v302_v34, %v257_v17  ;;  %v223_v37 = vadd.f32 %v314_v35, %v257_v17 }
  0xcf   :  { %v177_v38 = vpop.f32.mrf.mxu0  ;;  %v217_v39 = vpop.f32.mrf.mxu1 }
  0xd0   :  { %242 = vst.msk [vmem:[%s477_s3 + $0x28] sm:$0xff] %vm236_vm2, %v183_v36  ;;  %250 = vst.msk [vmem:[%s477_s3 + $0x68] sm:$0xff] %vm236_vm2, %v223_v37  ;;  %v178_v40 = vadd.f32 %v257_v17, %v177_v38  ;;  %v218_v41 = vadd.f32 %v257_v17, %v217_v39 }
  0xd1   :  { %v305_v42 = vpop.f32.mrf.mxu0  ;;  %v317_v43 = vpop.f32.mrf.mxu1 }
  0xd2   :  { %241 = vst.msk [vmem:[%s477_s3 + $0x20] sm:$0xff] %vm236_vm2, %v178_v40  ;;  %249 = vst.msk [vmem:[%s477_s3 + $0x60] sm:$0xff] %vm236_vm2, %v218_v41  ;;  %v193_v44 = vadd.f32 %v305_v42, %v257_v17  ;;  %v233_v45 = vadd.f32 %v317_v43, %v257_v17 }
  0xd3   :  { %v187_v46 = vpop.f32.mrf.mxu0  ;;  %v227_v47 = vpop.f32.mrf.mxu1 }
  0xd4   :  { %244 = vst.msk [vmem:[%s477_s3 + $0x38] sm:$0xff] %vm236_vm2, %v193_v44  ;;  %252 = vst.msk [vmem:[%s477_s3 + $0x78] sm:$0xff] %vm236_vm2, %v233_v45  ;;  %v188_v48 = vadd.f32 %v257_v17, %v187_v46  ;;  %v228_v49 = vadd.f32 %v257_v17, %v227_v47 }
  0xd6   :  { %243 = vst.msk [vmem:[%s477_s3 + $0x30] sm:$0xff] %vm236_vm2, %v188_v48  ;;  %251 = vst.msk [vmem:[%s477_s3 + $0x70] sm:$0xff] %vm236_vm2, %v228_v49 }

</bundles_post_ra>
